<compile_context>
chip_gen: v6e
topology: v6e:2x2x1
jax: 0.10.0
libtpu: 0.0.40
codegen_flags: <defaults>
</compile_context>

<pallas_src>
import jax
import jax.numpy as jnp
from jax.experimental import pallas as pl
from jax.experimental.pallas import tpu as pltpu

_SUBLANE = 8
# Per-buffer tile budget (f32): 2 MiB.  Pallas double-buffers input and output
# tiles -> peak ~4 x 2 MiB = 8 MiB VMEM, safe on v5e/v6e/v7x defaults.
_TILE_BYTES = 2 * 1024 * 1024


def _grad_norm_kernel(scale_ref, bias_ref, x_ref, o_ref):
    # scale/bias are scalar-prefetched into SMEM; x_ref / o_ref are lane-dense
    # VMEM tiles.  Compute in the input dtype (for f32 input the astype is a
    # no-op, so there is no up/down-cast round trip).
    s = scale_ref[0]
    b = bias_ref[0]
    o_ref[...] = (x_ref[...] * s + b).astype(o_ref.dtype)


def _pick_lane_width(n, last_dim):
    """Pick the widest lane-dense (multiple-of-128) width that divides n,
    preferring one whose row count is a multiple of 8 (no edge masking)."""
    widths = (4096, 2048, 1024, 512, 256, 128)
    for w in widths:
        if n % w == 0 and (n // w) % _SUBLANE == 0:
            return w
    for w in widths:
        if n % w == 0:
            return w
    # Fallback: original minor dim.  Block last dim == full array dim, which
    # satisfies the (8,128) rule even if narrow.
    return last_dim


def _round_up(v, m):
    return ((v + m - 1) // m) * m


def grad_norm_forward(x, scale, bias):
    """Forward of GradNorm: y = scale * x + bias.

    x: NCHW array. scale, bias: shape-(1,) float32 buffers.
    With the module's deterministic init (scale=1, bias=0) this is identity.
    """
    orig_shape = x.shape
    n = x.size
    itemsize = jnp.dtype(x.dtype).itemsize

    # Lane-dense 2D view of the contiguous tensor -- a free reshape, no
    # jnp.pad / post-slice HBM passes.
    wl = _pick_lane_width(n, orig_shape[-1])
    rows = n // wl
    x2d = x.reshape(rows, wl)

    # Row tile sized to ~_TILE_BYTES per buffer, multiple of 8 sublanes,
    # clamped to what the array actually needs.
    tm = max(_SUBLANE, (_TILE_BYTES // (wl * itemsize)) // _SUBLANE * _SUBLANE)
    tm = min(tm, _round_up(rows, _SUBLANE))
    grid = (pl.cdiv(rows, tm),)  # ragged row edge (if any) is masked by Pallas

    out2d = pl.pallas_call(
        _grad_norm_kernel,
        out_shape=jax.ShapeDtypeStruct((rows, wl), x.dtype),
        grid_spec=pltpu.PrefetchScalarGridSpec(
            num_scalar_prefetch=2,  # scale, bias -> SMEM
            grid=grid,
            in_specs=[
                pl.BlockSpec((tm, wl), lambda i, s_ref, b_ref: (i, 0)),
            ],
            out_specs=pl.BlockSpec((tm, wl), lambda i, s_ref, b_ref: (i, 0)),
        ),
        compiler_params=pltpu.CompilerParams(
            dimension_semantics=("parallel",)),
        cost_estimate=pl.CostEstimate(
            flops=2 * n,
            transcendentals=0,
            bytes_accessed=2 * n * itemsize + 2 * itemsize),
    )(scale, bias, x2d)

    return out2d.reshape(orig_shape)


if __name__ == "__main__":
    key = jax.random.PRNGKey(0)
    # NCHW input, small shapes.
    x = jax.random.normal(key, (2, 4, 16, 16), dtype=jnp.float32)

    # Deterministic buffer init, per the module's __init__.
    scale = jnp.array([1.0], dtype=jnp.float32)
    bias = jnp.array([0.0], dtype=jnp.float32)

    y = jax.block_until_ready(grad_norm_forward(x, scale, bias))

    # Forward is identity with the default buffers: verify.
    assert y.shape == x.shape and y.dtype == x.dtype
    assert jnp.allclose(y, x, atol=1e-6), "GradNorm forward should be identity"

    # TODO(synk): the backward-hook buffer updates (EMA of grad_output std/mean)
    # are training-time autograd side effects and are not part of the forward
    # kernel.  A static fast path (skip the launch when scale==1, bias==0) is
    # only possible when the buffers are compile-time constants; here they are
    # traced arrays, so the affine kernel runs.

    print("KERNEL_OK")
</pallas_src>

<mosaic_0001>
module attributes {stable_mosaic.version = 11 : i64} {
  func.func @_grad_norm_kernel(%arg0: i32, %arg1: memref<1xf32, #tpu.memory_space<smem>>, %arg2: memref<1xf32, #tpu.memory_space<smem>>, %arg3: memref<8x256xf32, #tpu.memory_space<vmem>>, %arg4: memref<8x256xf32, #tpu.memory_space<vmem>>) attributes {dimension_semantics = [#tpu.dimension_semantics<parallel>], iteration_bounds = array<i64: 1>, scalar_prefetch = 2 : i64, scratch_operands = 0 : i64, tpu.core_type = #tpu.core_type<tc>, window_params = [{transform_indices = @transform_0, window_bounds = array<i64: 8, 256>}, {transform_indices = @transform_1, window_bounds = array<i64: 8, 256>}]} {
    %c0 = arith.constant 0 : index
    %0 = memref.load %arg1[%c0] : memref<1xf32, #tpu.memory_space<smem>>
    %c0_0 = arith.constant 0 : index
    %1 = memref.load %arg2[%c0_0] : memref<1xf32, #tpu.memory_space<smem>>
    %c0_1 = arith.constant 0 : index
    %c0_2 = arith.constant 0 : index
    %2 = vector.load %arg3[%c0_1, %c0_2] : memref<8x256xf32, #tpu.memory_space<vmem>>, vector<8x256xf32>
    %3 = vector.broadcast %0 : f32 to vector<8x256xf32>
    %4 = arith.mulf %2, %3 : vector<8x256xf32>
    %5 = vector.broadcast %1 : f32 to vector<8x256xf32>
    %6 = arith.addf %4, %5 : vector<8x256xf32>
    %c0_3 = arith.constant 0 : index
    %c0_4 = arith.constant 0 : index
    %7 = vector.load %arg4[%c0_3, %c0_4] : memref<8x256xf32, #tpu.memory_space<vmem>>, vector<8x256xf32>
    tpu.vector_store %arg4[%c0_3, %c0_4], %6 {strides = array<i32>} : memref<8x256xf32, #tpu.memory_space<vmem>>, vector<8x256xf32>,
    return
  }
  func.func @transform_0(%arg0: i32, %arg1: memref<1xf32, #tpu.memory_space<smem>>, %arg2: memref<1xf32, #tpu.memory_space<smem>>) -> (i32, i32) {
    %c0_i32 = arith.constant 0 : i32
    %c0_i32_0 = arith.constant 0 : i32
    return %arg0, %c0_i32 : i32, i32
  }
  func.func @transform_1(%arg0: i32, %arg1: memref<1xf32, #tpu.memory_space<smem>>, %arg2: memref<1xf32, #tpu.memory_space<smem>>) -> (i32, i32) {
    %c0_i32 = arith.constant 0 : i32
    %c0_i32_0 = arith.constant 0 : i32
    return %arg0, %c0_i32 : i32, i32
  }
}

</mosaic_0001>

<bundles_post_ra>
// kernel: tpu_custom_call.1
= control target key start
LH: loop header
LB: loop body
LE: loop exit
PB: predicated region body
PF: predicated region fallthrough
CT: control target
= control target key end

     0   :  { %10 = vsyncpa [#allocation6], 0  ;;  %s132_s0 = inlined_call_operand.<no memory space> [shape: f32[1], index: 0, kind: input, shape index: {}]   ;;  %s133_s1 = inlined_call_operand.<no memory space> [shape: f32[1], index: 1, kind: input, shape index: {}]   ;;  %s134_s2 = inlined_call_operand.hbm [shape: f32[8,256], index: 2, kind: input, shape index: {}]   ;;  %s135_s3 = inlined_call_operand.hbm [shape: f32[8,256], index: 3, kind: output, shape index: {}]  }
   0x1   :  { %11 = vsyncpa [#allocation7], 0  ;;  %s98_s12 = smov [#allocation5]  }
   0x2   :  { %s18_s13 = sshll.u32 %s98_s12, 4  ;;  %s19_s13 = int_to_ptr.vmem [resolvable:$true] %s18_s13 }
   0x3   :  { %s62_s14 = scalar_lea.vmem %s19_s13, 256  ;;  %p67_p1 = scmp.lt.s32.totalorder %s19_s13, %s19_s13 }
   0x4   :  { %p63_p0 = scmp.ne.s32.totalorder %s19_s13, %s62_s14  ;;  %p68_p2 = scmp.lt.s32.totalorder %s62_s14, %s62_s14 }
   0x6   :  { %p69_p3 = por %p68_p2, %p67_p1 }
   0x8   :  { %p70_p4 = pnand %p69_p3, %p63_p0 }
   0xa   :  { %73 = shalt.err (!%p70_p4)
}
   0xb   :  { %21 = dma.hbm_to_vmem [thread:$0]  %s134_s2, 256, %s19_s13, [#allocation6]  }
   0xc   :  { %94 = dma.done.wait [#allocation6], 256  }
   0xd   :  { %95 = vsyncadd [#allocation6], 4294967040  ;;  %v29_v0 = vstv %s132_s0  ;;  %v27_v1 = vld [vmem:[#allocation5] sm:$0xff]  ;;  %v32_v2 = vstv %s133_s1  ;;  %v28_v3 = vld [vmem:[#allocation5 + $0x8] sm:$0xff]  ;;  %s99_s21 = smov [#allocation8]  }
   0xe   :  { %s43_s22 = sshll.u32 %s99_s21, 4  ;;  %v30_v4 = vmul.f32 %v29_v0, %v27_v1  ;;  %v31_v5 = vmul.f32 %v29_v0, %v28_v3  ;;  %s44_s22 = int_to_ptr.vmem [resolvable:$true] %s43_s22 }
   0xf   :  { %s74_s2 = scalar_lea.vmem %s44_s22, 256  ;;  %p79_p6 = scmp.lt.s32.totalorder %s44_s22, %s44_s22 }
  0x10   :  { %v33_v6 = vadd.f32 %v32_v2, %v30_v4  ;;  %v34_v7 = vadd.f32 %v32_v2, %v31_v5  ;;  %p75_p5 = scmp.ne.s32.totalorder %s44_s22, %s74_s2  ;;  %p80_p7 = scmp.lt.s32.totalorder %s74_s2, %s74_s2 }
  0x12   :  { %35 = vst [vmem:[#allocation8] sm:$0xff] %v33_v6  ;;  %36 = vst [vmem:[#allocation8 + $0x8] sm:$0xff] %v34_v7  ;;  %p81_p8 = por %p80_p7, %p79_p6 }
  0x14   :  { %p82_p9 = pnand %p81_p8, %p75_p5 }
  0x16   :  { %85 = shalt.err (!%p82_p9)
}
  0x17   :  { %46 = dma.vmem_to_hbm [thread:$0]  %s44_s22, 256, %s135_s3, [#allocation7]  }
  0x18   :  { %96 = dma.done.wait [#allocation7], 256  }
  0x19   :  { %97 = vsyncadd [#allocation7], 4294967040 }
  0x1a   :  { %50 = vsyncpa [#allocation6], 1 }
  0x1b   :  { %51 = vsyncpa [#allocation7], 1 }

</bundles_post_ra>
